<compile_context>
chip_gen: v5e
topology: v5e:2x2
jax: 0.10.0
libtpu: 0.0.40
codegen_flags: <defaults>
</compile_context>

<pallas_src>
import functools

import jax
import jax.numpy as jnp
from jax import lax
from jax.experimental import pallas as pl
from jax.experimental.pallas import tpu as pltpu


def _pcen_kernel(w_ref, a_ref, alpha_ref, oor_ref, delta_ref, droot_ref,
                 x_ref, o_ref, state_ref, *, floor):
    """One (Rblk, Tblk) tile: EMA scan over the lane (time) axis + PCEN math.

    w_ref..droot_ref : (Rblk, 1) f32   per-row (= per batch*channel) parameters
    x_ref, o_ref     : (Rblk, Tblk)    input / output tile (time on lanes)
    state_ref        : (Rblk, 1) f32   EMA carry across time blocks (VMEM scratch)
    """
    t_idx = pl.program_id(1)

    x = x_ref[...].astype(jnp.float32)            # (R, L)
    R, L = x.shape

    w = w_ref[...]                                # (R, 1)  clipped smoothing coeff
    a = a_ref[...]                                # (R, 1)  1 - w
    alpha = alpha_ref[...]                        # (R, 1)  min(alpha, 1)
    oor = oor_ref[...]                            # (R, 1)  1 / max(root, 1)
    delta = delta_ref[...]                        # (R, 1)
    droot = droot_ref[...]                        # (R, 1)  delta ** (1/root)

    lane = lax.broadcasted_iota(jnp.int32, (R, L), 1)   # time index within the tile

    # First time block of every row block: carry-in is x[:, 0] (PyTorch init_state).
    @pl.when(t_idx == 0)
    def _init():
        first_col = jnp.sum(jnp.where(lane == 0, x, 0.0), axis=1, keepdims=True)
        state_ref[...] = first_col

    carry = state_ref[...]                        # (R, 1)  acc_{-1} for this tile

    # Hillis-Steele inclusive scan of  acc_t = a*acc_{t-1} + w*x_t  along lanes.
    # Affine-pair form: after the scan, acc_t = A[t]*carry + B[t] with
    #   A[t] = a^(t+1),  B[t] = sum_{j<=t} a^(t-j) * w * x_j.
    A = jnp.broadcast_to(a, (R, L))
    B = w * x
    d = 1
    while d < L:                                  # unrolled at trace time: ceil(log2(L)) passes
        keep = lane >= d
        A_sh = jnp.where(keep, pltpu.roll(A, shift=d, axis=1), 1.0)
        B_sh = jnp.where(keep, pltpu.roll(B, shift=d, axis=1), 0.0)
        B = B + A * B_sh
        A = A * A_sh
        d *= 2

    ema = A * carry + B                           # (R, L)

    # Carry for the next time block = last column of ema (masked lane reduction).
    state_ref[...] = jnp.sum(jnp.where(lane == (L - 1), ema, 0.0),
                             axis=1, keepdims=True)

    # Fused PCEN pointwise math; pow done as exp/log (EUP slot, overlaps VPU work).
    smooth = floor + ema                                   # > 0 for valid data
    norm = x * jnp.exp(-alpha * jnp.log(smooth))           # x / (floor + ema)**alpha
    out = jnp.exp(oor * jnp.log(norm + delta)) - droot
    o_ref[...] = out.astype(o_ref.dtype)


def pcen(x, smooth_weights, alpha, delta, root, *, floor=1e-6,
         max_time_block=512, max_row_block=256):
    """PCENLayer.forward.  x: (B, C, T); all params: (C,).  Returns (B, C, T)."""
    B, C, T = x.shape
    out_dtype = x.dtype
    BC = B * C
    f32 = jnp.float32

    # Per-channel derived parameters (tiny; computed once in the wrapper).
    w = jnp.clip(smooth_weights.astype(f32), 0.02, 1.0)
    a = 1.0 - w
    al = jnp.minimum(alpha.astype(f32), 1.0)
    oor = 1.0 / jnp.maximum(root.astype(f32), 1.0)
    dl = delta.astype(f32)
    droot = dl ** oor

    def per_row(p):                                # (C,) -> (B*C, 1); row = b*C + c
        return jnp.tile(p, (B,)).reshape(BC, 1)

    params = [per_row(p) for p in (w, a, al, oor, dl, droot)]

    # Free reshape: keep the caller's (B, C, T) memory layout, no transposes.
    x2 = x.reshape(BC, T)

    # Time tiling: if T >= 128, every tile's lane dim is a multiple of 128
    # (lane-dense stores); partial last time blocks are masked by Pallas and the
    # causal scan keeps garbage lanes from contaminating valid lanes.
    if T < 128:
        T_k = 128
        x2 = jnp.pad(x2, ((0, 0), (0, T_k - T)))   # cheap: only when T is tiny
        t_blk = 128
    else:
        T_k = T
        t_blk = min(max_time_block, 128 * (T // 128))
    n_t = pl.cdiv(T_k, t_blk)

    # Row tiling: gives a "parallel" grid axis (split across TCs on multi-core chips).
    if BC <= max_row_block:
        r_blk = BC                                 # block == full dim: always legal
    else:
        r_blk = max_row_block                      # multiple of 8; partial last block OK
    n_r = pl.cdiv(BC, r_blk)

    grid = (n_r, n_t)
    kernel = functools.partial(_pcen_kernel, floor=float(floor))

    par_spec = pl.BlockSpec((r_blk, 1), lambda r, t: (r, 0))
    tile_spec = pl.BlockSpec((r_blk, t_blk), lambda r, t: (r, t))

    out2 = pl.pallas_call(
        kernel,
        out_shape=jax.ShapeDtypeStruct((BC, T_k), out_dtype),
        grid_spec=pltpu.PrefetchScalarGridSpec(
            num_scalar_prefetch=0,
            grid=grid,
            in_specs=[par_spec] * 6 + [tile_spec],
            out_specs=pl.BlockSpec((r_blk, t_blk), lambda r, t: (r, t)),
            scratch_shapes=[pltpu.VMEM((r_blk, 1), jnp.float32)],
        ),
        compiler_params=pltpu.CompilerParams(
            dimension_semantics=("parallel", "arbitrary"),
            vmem_limit_bytes=32 * 1024 * 1024,
        ),
    )(*params, x2)

    if T_k != T:
        out2 = out2[:, :T]
    return out2.reshape(B, C, T)


def _pcen_reference(x, smooth_weights, alpha, delta, root, floor=1e-6):
    """Pure-JAX reference matching the PyTorch module (serial scan)."""
    w = jnp.clip(smooth_weights, 0.02, 1.0)          # (C,)
    x_t = jnp.transpose(x, (2, 0, 1))                # (T, B, C)

    def step(acc, xt):
        acc = w * xt + (1.0 - w) * acc
        return acc, acc

    _, ema_t = lax.scan(step, x_t[0], x_t)
    ema = jnp.transpose(ema_t, (1, 2, 0))            # (B, C, T)

    al = jnp.minimum(alpha, 1.0)[None, :, None]
    rt = jnp.maximum(root, 1.0)[None, :, None]
    dl = delta[None, :, None]
    oor = 1.0 / rt
    return (x / (floor + ema) ** al + dl) ** oor - dl ** oor


if __name__ == "__main__":
    B, C, T = 2, 4, 16
    key = jax.random.PRNGKey(0)
    k1, k2, k3, k4, k5 = jax.random.split(key, 5)

    # PCEN operates on non-negative filterbank energies.
    x = jax.random.uniform(k1, (B, C, T), dtype=jnp.float32, minval=0.01, maxval=1.0)

    # Per-channel parameters around the PyTorch inits, perturbed so the clamps and
    # per-channel broadcasts are actually exercised.
    smooth = 0.06 * jax.random.uniform(k2, (C,), dtype=jnp.float32)          # some < 0.02
    alpha = 0.94 + 0.10 * jax.random.uniform(k3, (C,), dtype=jnp.float32)    # some > 1.0
    delta = 2.00 + 0.10 * jax.random.uniform(k4, (C,), dtype=jnp.float32)
    root = 0.80 + 0.40 * jax.random.uniform(k5, (C,), dtype=jnp.float32)     # some < 1.0

    out = pcen(x, smooth, alpha, delta, root)
    out = jax.block_until_ready(out)

    ref = _pcen_reference(x, smooth, alpha, delta, root)
    assert out.shape == (B, C, T)
    max_err = float(jnp.max(jnp.abs(out - ref)))
    assert jnp.allclose(out, ref, atol=5e-4, rtol=5e-4), (
        f"mismatch vs reference, max abs err = {max_err}")

    print("KERNEL_OK")
</pallas_src>

<mosaic_0001>
module attributes {stable_mosaic.version = 11 : i64} {
  func.func @_pcen_kernel(%arg0: i32, %arg1: i32, %arg2: memref<8x1xf32, #tpu.memory_space<vmem>>, %arg3: memref<8x1xf32, #tpu.memory_space<vmem>>, %arg4: memref<8x1xf32, #tpu.memory_space<vmem>>, %arg5: memref<8x1xf32, #tpu.memory_space<vmem>>, %arg6: memref<8x1xf32, #tpu.memory_space<vmem>>, %arg7: memref<8x1xf32, #tpu.memory_space<vmem>>, %arg8: memref<8x128xf32, #tpu.memory_space<vmem>>, %arg9: memref<8x128xf32, #tpu.memory_space<vmem>>, %arg10: memref<8x1xf32, #tpu.memory_space<vmem>>) attributes {dimension_semantics = [#tpu.dimension_semantics<parallel>, #tpu.dimension_semantics<arbitrary>], iteration_bounds = array<i64: 1, 1>, scalar_prefetch = 0 : i64, scratch_operands = 1 : i64, tpu.core_type = #tpu.core_type<tc>, window_params = [{transform_indices = @transform_0, window_bounds = array<i64: 8, 1>}, {transform_indices = @transform_1, window_bounds = array<i64: 8, 1>}, {transform_indices = @transform_2, window_bounds = array<i64: 8, 1>}, {transform_indices = @transform_3, window_bounds = array<i64: 8, 1>}, {transform_indices = @transform_4, window_bounds = array<i64: 8, 1>}, {transform_indices = @transform_5, window_bounds = array<i64: 8, 1>}, {transform_indices = @transform_6, window_bounds = array<i64: 8, 128>}, {transform_indices = @transform_7, window_bounds = array<i64: 8, 128>}]} {
    %c0 = arith.constant 0 : index
    %c0_0 = arith.constant 0 : index
    %0 = vector.load %arg8[%c0, %c0_0] : memref<8x128xf32, #tpu.memory_space<vmem>>, vector<8x128xf32>
    %c0_1 = arith.constant 0 : index
    %c0_2 = arith.constant 0 : index
    %1 = vector.load %arg2[%c0_1, %c0_2] : memref<8x1xf32, #tpu.memory_space<vmem>>, vector<8x1xf32>
    %c0_3 = arith.constant 0 : index
    %c0_4 = arith.constant 0 : index
    %2 = vector.load %arg3[%c0_3, %c0_4] : memref<8x1xf32, #tpu.memory_space<vmem>>, vector<8x1xf32>
    %c0_5 = arith.constant 0 : index
    %c0_6 = arith.constant 0 : index
    %3 = vector.load %arg4[%c0_5, %c0_6] : memref<8x1xf32, #tpu.memory_space<vmem>>, vector<8x1xf32>
    %c0_7 = arith.constant 0 : index
    %c0_8 = arith.constant 0 : index
    %4 = vector.load %arg5[%c0_7, %c0_8] : memref<8x1xf32, #tpu.memory_space<vmem>>, vector<8x1xf32>
    %c0_9 = arith.constant 0 : index
    %c0_10 = arith.constant 0 : index
    %5 = vector.load %arg6[%c0_9, %c0_10] : memref<8x1xf32, #tpu.memory_space<vmem>>, vector<8x1xf32>
    %c0_11 = arith.constant 0 : index
    %c0_12 = arith.constant 0 : index
    %6 = vector.load %arg7[%c0_11, %c0_12] : memref<8x1xf32, #tpu.memory_space<vmem>>, vector<8x1xf32>
    %7 = tpu.iota {dimensions = array<i32: 1>} : vector<8x128xi32>
    %c0_i32 = arith.constant 0 : i32
    %8 = arith.cmpi eq, %arg1, %c0_i32 : i32
    %9 = arith.extui %8 : i1 to i32
    %c0_i32_13 = arith.constant 0 : i32
    %10 = arith.cmpi ne, %9, %c0_i32_13 : i32
    scf.if %10 {
      %c0_i32_51 = arith.constant 0 : i32
      %121 = vector.broadcast %c0_i32_51 : i32 to vector<8x128xi32>
      %122 = arith.cmpi eq, %7, %121 : vector<8x128xi32>
      %cst_52 = arith.constant 0.000000e+00 : f32
      %123 = vector.broadcast %cst_52 : f32 to vector<8x128xf32>
      %124 = arith.select %122, %0, %123 : vector<8x128xi1>, vector<8x128xf32>
      %cst_53 = arith.constant dense<0.000000e+00> : vector<8xf32>
      %125 = vector.multi_reduction <add>, %124, %cst_53 [1] : vector<8x128xf32> to vector<8xf32>
      %126 = vector.shape_cast %125 : vector<8xf32> to vector<8x1xf32>
      %c0_54 = arith.constant 0 : index
      %c0_55 = arith.constant 0 : index
      %127 = vector.load %arg10[%c0_54, %c0_55] : memref<8x1xf32, #tpu.memory_space<vmem>>, vector<8x1xf32>
      tpu.vector_store %arg10[%c0_54, %c0_55], %126 {strides = array<i32>} : memref<8x1xf32, #tpu.memory_space<vmem>>, vector<8x1xf32>,
    } else {
    }
    %c0_14 = arith.constant 0 : index
    %c0_15 = arith.constant 0 : index
    %11 = vector.load %arg10[%c0_14, %c0_15] : memref<8x1xf32, #tpu.memory_space<vmem>>, vector<8x1xf32>
    %12 = vector.shape_cast %2 : vector<8x1xf32> to vector<8x1xf32>
    %13 = vector.broadcast %12 : vector<8x1xf32> to vector<8x128xf32>
    %14 = vector.broadcast %1 : vector<8x1xf32> to vector<8x128xf32>
    %15 = arith.mulf %14, %0 : vector<8x128xf32>
    %c1_i32 = arith.constant 1 : i32
    %16 = vector.broadcast %c1_i32 : i32 to vector<8x128xi32>
    %17 = arith.cmpi sge, %7, %16 : vector<8x128xi32>
    %c1_i32_16 = arith.constant 1 : i32
    %18 = tpu.dynamic_rotate %13 by %c1_i32_16 dim 1 : vector<8x128xf32>, i32 -> vector<8x128xf32>
    %cst = arith.constant 1.000000e+00 : f32
    %19 = vector.broadcast %cst : f32 to vector<8x128xf32>
    %20 = arith.select %17, %18, %19 : vector<8x128xi1>, vector<8x128xf32>
    %c1_i32_17 = arith.constant 1 : i32
    %21 = tpu.dynamic_rotate %15 by %c1_i32_17 dim 1 : vector<8x128xf32>, i32 -> vector<8x128xf32>
    %cst_18 = arith.constant 0.000000e+00 : f32
    %22 = vector.broadcast %cst_18 : f32 to vector<8x128xf32>
    %23 = arith.select %17, %21, %22 : vector<8x128xi1>, vector<8x128xf32>
    %24 = arith.mulf %13, %23 : vector<8x128xf32>
    %25 = arith.addf %15, %24 : vector<8x128xf32>
    %26 = arith.mulf %13, %20 : vector<8x128xf32>
    %c2_i32 = arith.constant 2 : i32
    %27 = vector.broadcast %c2_i32 : i32 to vector<8x128xi32>
    %28 = arith.cmpi sge, %7, %27 : vector<8x128xi32>
    %c2_i32_19 = arith.constant 2 : i32
    %29 = tpu.dynamic_rotate %26 by %c2_i32_19 dim 1 : vector<8x128xf32>, i32 -> vector<8x128xf32>
    %cst_20 = arith.constant 1.000000e+00 : f32
    %30 = vector.broadcast %cst_20 : f32 to vector<8x128xf32>
    %31 = arith.select %28, %29, %30 : vector<8x128xi1>, vector<8x128xf32>
    %c2_i32_21 = arith.constant 2 : i32
    %32 = tpu.dynamic_rotate %25 by %c2_i32_21 dim 1 : vector<8x128xf32>, i32 -> vector<8x128xf32>
    %cst_22 = arith.constant 0.000000e+00 : f32
    %33 = vector.broadcast %cst_22 : f32 to vector<8x128xf32>
    %34 = arith.select %28, %32, %33 : vector<8x128xi1>, vector<8x128xf32>
    %35 = arith.mulf %26, %34 : vector<8x128xf32>
    %36 = arith.addf %25, %35 : vector<8x128xf32>
    %37 = arith.mulf %26, %31 : vector<8x128xf32>
    %c4_i32 = arith.constant 4 : i32
    %38 = vector.broadcast %c4_i32 : i32 to vector<8x128xi32>
    %39 = arith.cmpi sge, %7, %38 : vector<8x128xi32>
    %c4_i32_23 = arith.constant 4 : i32
    %40 = tpu.dynamic_rotate %37 by %c4_i32_23 dim 1 : vector<8x128xf32>, i32 -> vector<8x128xf32>
    %cst_24 = arith.constant 1.000000e+00 : f32
    %41 = vector.broadcast %cst_24 : f32 to vector<8x128xf32>
    %42 = arith.select %39, %40, %41 : vector<8x128xi1>, vector<8x128xf32>
    %c4_i32_25 = arith.constant 4 : i32
    %43 = tpu.dynamic_rotate %36 by %c4_i32_25 dim 1 : vector<8x128xf32>, i32 -> vector<8x128xf32>
    %cst_26 = arith.constant 0.000000e+00 : f32
    %44 = vector.broadcast %cst_26 : f32 to vector<8x128xf32>
    %45 = arith.select %39, %43, %44 : vector<8x128xi1>, vector<8x128xf32>
    %46 = arith.mulf %37, %45 : vector<8x128xf32>
    %47 = arith.addf %36, %46 : vector<8x128xf32>
    %48 = arith.mulf %37, %42 : vector<8x128xf32>
    %c8_i32 = arith.constant 8 : i32
    %49 = vector.broadcast %c8_i32 : i32 to vector<8x128xi32>
    %50 = arith.cmpi sge, %7, %49 : vector<8x128xi32>
    %c8_i32_27 = arith.constant 8 : i32
    %51 = tpu.dynamic_rotate %48 by %c8_i32_27 dim 1 : vector<8x128xf32>, i32 -> vector<8x128xf32>
    %cst_28 = arith.constant 1.000000e+00 : f32
    %52 = vector.broadcast %cst_28 : f32 to vector<8x128xf32>
    %53 = arith.select %50, %51, %52 : vector<8x128xi1>, vector<8x128xf32>
    %c8_i32_29 = arith.constant 8 : i32
    %54 = tpu.dynamic_rotate %47 by %c8_i32_29 dim 1 : vector<8x128xf32>, i32 -> vector<8x128xf32>
    %cst_30 = arith.constant 0.000000e+00 : f32
    %55 = vector.broadcast %cst_30 : f32 to vector<8x128xf32>
    %56 = arith.select %50, %54, %55 : vector<8x128xi1>, vector<8x128xf32>
    %57 = arith.mulf %48, %56 : vector<8x128xf32>
    %58 = arith.addf %47, %57 : vector<8x128xf32>
    %59 = arith.mulf %48, %53 : vector<8x128xf32>
    %c16_i32 = arith.constant 16 : i32
    %60 = vector.broadcast %c16_i32 : i32 to vector<8x128xi32>
    %61 = arith.cmpi sge, %7, %60 : vector<8x128xi32>
    %c16_i32_31 = arith.constant 16 : i32
    %62 = tpu.dynamic_rotate %59 by %c16_i32_31 dim 1 : vector<8x128xf32>, i32 -> vector<8x128xf32>
    %cst_32 = arith.constant 1.000000e+00 : f32
    %63 = vector.broadcast %cst_32 : f32 to vector<8x128xf32>
    %64 = arith.select %61, %62, %63 : vector<8x128xi1>, vector<8x128xf32>
    %c16_i32_33 = arith.constant 16 : i32
    %65 = tpu.dynamic_rotate %58 by %c16_i32_33 dim 1 : vector<8x128xf32>, i32 -> vector<8x128xf32>
    %cst_34 = arith.constant 0.000000e+00 : f32
    %66 = vector.broadcast %cst_34 : f32 to vector<8x128xf32>
    %67 = arith.select %61, %65, %66 : vector<8x128xi1>, vector<8x128xf32>
    %68 = arith.mulf %59, %67 : vector<8x128xf32>
    %69 = arith.addf %58, %68 : vector<8x128xf32>
    %70 = arith.mulf %59, %64 : vector<8x128xf32>
    %c32_i32 = arith.constant 32 : i32
    %71 = vector.broadcast %c32_i32 : i32 to vector<8x128xi32>
    %72 = arith.cmpi sge, %7, %71 : vector<8x128xi32>
    %c32_i32_35 = arith.constant 32 : i32
    %73 = tpu.dynamic_rotate %70 by %c32_i32_35 dim 1 : vector<8x128xf32>, i32 -> vector<8x128xf32>
    %cst_36 = arith.constant 1.000000e+00 : f32
    %74 = vector.broadcast %cst_36 : f32 to vector<8x128xf32>
    %75 = arith.select %72, %73, %74 : vector<8x128xi1>, vector<8x128xf32>
    %c32_i32_37 = arith.constant 32 : i32
    %76 = tpu.dynamic_rotate %69 by %c32_i32_37 dim 1 : vector<8x128xf32>, i32 -> vector<8x128xf32>
    %cst_38 = arith.constant 0.000000e+00 : f32
    %77 = vector.broadcast %cst_38 : f32 to vector<8x128xf32>
    %78 = arith.select %72, %76, %77 : vector<8x128xi1>, vector<8x128xf32>
    %79 = arith.mulf %70, %78 : vector<8x128xf32>
    %80 = arith.addf %69, %79 : vector<8x128xf32>
    %81 = arith.mulf %70, %75 : vector<8x128xf32>
    %c64_i32 = arith.constant 64 : i32
    %82 = vector.broadcast %c64_i32 : i32 to vector<8x128xi32>
    %83 = arith.cmpi sge, %7, %82 : vector<8x128xi32>
    %c64_i32_39 = arith.constant 64 : i32
    %84 = tpu.dynamic_rotate %81 by %c64_i32_39 dim 1 : vector<8x128xf32>, i32 -> vector<8x128xf32>
    %cst_40 = arith.constant 1.000000e+00 : f32
    %85 = vector.broadcast %cst_40 : f32 to vector<8x128xf32>
    %86 = arith.select %83, %84, %85 : vector<8x128xi1>, vector<8x128xf32>
    %c64_i32_41 = arith.constant 64 : i32
    %87 = tpu.dynamic_rotate %80 by %c64_i32_41 dim 1 : vector<8x128xf32>, i32 -> vector<8x128xf32>
    %cst_42 = arith.constant 0.000000e+00 : f32
    %88 = vector.broadcast %cst_42 : f32 to vector<8x128xf32>
    %89 = arith.select %83, %87, %88 : vector<8x128xi1>, vector<8x128xf32>
    %90 = arith.mulf %81, %89 : vector<8x128xf32>
    %91 = arith.addf %80, %90 : vector<8x128xf32>
    %92 = arith.mulf %81, %86 : vector<8x128xf32>
    %93 = vector.broadcast %11 : vector<8x1xf32> to vector<8x128xf32>
    %94 = arith.mulf %92, %93 : vector<8x128xf32>
    %95 = arith.addf %94, %91 : vector<8x128xf32>
    %c127_i32 = arith.constant 127 : i32
    %96 = vector.broadcast %c127_i32 : i32 to vector<8x128xi32>
    %97 = arith.cmpi eq, %7, %96 : vector<8x128xi32>
    %cst_43 = arith.constant 0.000000e+00 : f32
    %98 = vector.broadcast %cst_43 : f32 to vector<8x128xf32>
    %99 = arith.select %97, %95, %98 : vector<8x128xi1>, vector<8x128xf32>
    %cst_44 = arith.constant dense<0.000000e+00> : vector<8xf32>
    %100 = vector.multi_reduction <add>, %99, %cst_44 [1] : vector<8x128xf32> to vector<8xf32>
    %101 = vector.shape_cast %100 : vector<8xf32> to vector<8x1xf32>
    %c0_45 = arith.constant 0 : index
    %c0_46 = arith.constant 0 : index
    %102 = vector.load %arg10[%c0_45, %c0_46] : memref<8x1xf32, #tpu.memory_space<vmem>>, vector<8x1xf32>
    tpu.vector_store %arg10[%c0_45, %c0_46], %101 {strides = array<i32>} : memref<8x1xf32, #tpu.memory_space<vmem>>, vector<8x1xf32>,
    %cst_47 = arith.constant 9.99999997E-7 : f32
    %103 = vector.broadcast %cst_47 : f32 to vector<8x128xf32>
    %104 = arith.addf %103, %95 : vector<8x128xf32>
    %cst_48 = arith.constant 0.000000e+00 : f32
    %105 = vector.broadcast %cst_48 : f32 to vector<8x1xf32>
    %106 = arith.subf %105, %3 : vector<8x1xf32>
    %107 = math.log %104 : vector<8x128xf32>
    %108 = vector.broadcast %106 : vector<8x1xf32> to vector<8x128xf32>
    %109 = arith.mulf %108, %107 : vector<8x128xf32>
    %110 = math.exp %109 : vector<8x128xf32>
    %111 = arith.mulf %0, %110 : vector<8x128xf32>
    %112 = vector.broadcast %5 : vector<8x1xf32> to vector<8x128xf32>
    %113 = arith.addf %111, %112 : vector<8x128xf32>
    %114 = math.log %113 : vector<8x128xf32>
    %115 = vector.broadcast %4 : vector<8x1xf32> to vector<8x128xf32>
    %116 = arith.mulf %115, %114 : vector<8x128xf32>
    %117 = math.exp %116 : vector<8x128xf32>
    %118 = vector.broadcast %6 : vector<8x1xf32> to vector<8x128xf32>
    %119 = arith.subf %117, %118 : vector<8x128xf32>
    %c0_49 = arith.constant 0 : index
    %c0_50 = arith.constant 0 : index
    %120 = vector.load %arg9[%c0_49, %c0_50] : memref<8x128xf32, #tpu.memory_space<vmem>>, vector<8x128xf32>
    tpu.vector_store %arg9[%c0_49, %c0_50], %119 {strides = array<i32>} : memref<8x128xf32, #tpu.memory_space<vmem>>, vector<8x128xf32>,
    return
  }
  func.func @transform_0(%arg0: i32, %arg1: i32) -> (i32, i32) {
    %c0_i32 = arith.constant 0 : i32
    %c0_i32_0 = arith.constant 0 : i32
    return %arg0, %c0_i32 : i32, i32
  }
  func.func @transform_1(%arg0: i32, %arg1: i32) -> (i32, i32) {
    %c0_i32 = arith.constant 0 : i32
    %c0_i32_0 = arith.constant 0 : i32
    return %arg0, %c0_i32 : i32, i32
  }
  func.func @transform_2(%arg0: i32, %arg1: i32) -> (i32, i32) {
    %c0_i32 = arith.constant 0 : i32
    %c0_i32_0 = arith.constant 0 : i32
    return %arg0, %c0_i32 : i32, i32
  }
  func.func @transform_3(%arg0: i32, %arg1: i32) -> (i32, i32) {
    %c0_i32 = arith.constant 0 : i32
    %c0_i32_0 = arith.constant 0 : i32
    return %arg0, %c0_i32 : i32, i32
  }
  func.func @transform_4(%arg0: i32, %arg1: i32) -> (i32, i32) {
    %c0_i32 = arith.constant 0 : i32
    %c0_i32_0 = arith.constant 0 : i32
    return %arg0, %c0_i32 : i32, i32
  }
  func.func @transform_5(%arg0: i32, %arg1: i32) -> (i32, i32) {
    %c0_i32 = arith.constant 0 : i32
    %c0_i32_0 = arith.constant 0 : i32
    return %arg0, %c0_i32 : i32, i32
  }
  func.func @transform_6(%arg0: i32, %arg1: i32) -> (i32, i32) {
    %c0_i32 = arith.constant 0 : i32
    return %arg0, %arg1 : i32, i32
  }
  func.func @transform_7(%arg0: i32, %arg1: i32) -> (i32, i32) {
    %c0_i32 = arith.constant 0 : i32
    return %arg0, %arg1 : i32, i32
  }
}

</mosaic_0001>

<bundles_post_ra>
// kernel: tpu_custom_call.1
= control target key start
LH: loop header
LB: loop body
LE: loop exit
PB: predicated region body
PF: predicated region fallthrough
CT: control target
= control target key end

     0   :  { %s330_s0 = inlined_call_operand.vmem [shape: f32[8,1], index: 0, kind: input, shape index: {}]   ;;  %s331_s1 = inlined_call_operand.vmem [shape: f32[8,1], index: 1, kind: input, shape index: {}]   ;;  %s332_s2 = inlined_call_operand.vmem [shape: f32[8,1], index: 2, kind: input, shape index: {}]   ;;  %s333_s3 = inlined_call_operand.vmem [shape: f32[8,1], index: 3, kind: input, shape index: {}]   ;;  %s334_s4 = inlined_call_operand.vmem [shape: f32[8,1], index: 4, kind: input, shape index: {}]   ;;  %s335_s5 = inlined_call_operand.vmem [shape: f32[8,1], index: 5, kind: input, shape index: {}]   ;;  %s336_s6 = inlined_call_operand.vmem [shape: f32[8,128], index: 6, kind: input, shape index: {}]   ;;  %s337_s7 = inlined_call_operand.hbm [shape: f32[8,128], index: 7, kind: output, shape index: {}]  }
   0x1   :  { %v28_v0 = vld [vmem:[%s330_s0] sm:$0xff] }
   0x2   :  { %12 = vsyncpa [#allocation4], 0  ;;  %v239_v1 = vmov 0   ;;  %v29_v2 = vld [vmem:[%s331_s1] sm:$0xff]  ;;  %s240_s0 = smov 1   ;;  %v34_v7 = vlaneseq  ;;  %s241_s1 = smov 2  }
   0x3   :  { %202 = vset.pattern.permute.xlu0 %v239_v1  ;;  %203 = vset.pattern.permute.xlu1 %v239_v1  ;;  %v297_v3 = vld [vmem:[%s336_s6] sm:$0xff]  ;;  %s242_s6 = smov 4   ;;  %s243_s30 = smov 8   ;;  %vm44_vm6 = vcmask 7168  }
   0x4   :  { %54 = vperm.xlu0 %202, %v28_v0   ;;  %204 = vset.pattern.permute.xlu2 %v239_v1  ;;  %v300_v8 = vand.u32 127, %v34_v7  ;;  %s244_s8 = smov 16   ;;  %s245_s9 = smov 32   ;;  %v32_v50 = vld [vmem:[%s334_s4] sm:$0xff] }
   0x5   :  { %s246_s10 = smov 64   ;;  %v33_v53 = vld [vmem:[%s335_s5] sm:$0xff]  ;;  %s184_s19 = sshll.u32 %s337_s7, 4  ;;  %s185_s19 = int_to_ptr.hbm [resolvable:$true] %s184_s19 }
   0x6   :  { %vm58_vm0 = vcmp.ge.s32.totalorder %v300_v8, 1  ;;  %vm68_vm1 = vcmp.ge.s32.totalorder %v300_v8, 2  ;;  %vm78_vm2 = vcmp.ge.s32.totalorder %v300_v8, 4  ;;  %vm88_vm3 = vcmp.ge.s32.totalorder %v300_v8, 8  ;;  %v30_v56 = vld [vmem:[%s332_s2] sm:$0xff]  ;;  %s247_s2 = smov [#allocation3]  }
   0x7   :  { %vm40_vm4 = vcmp.eq.s32.totalorder %v300_v8, 0  ;;  %vm98_vm5 = vcmp.ge.s32.totalorder %v300_v8, 16  ;;  %vm108_vm7 = vcmp.ge.s32.totalorder %v300_v8, 32  ;;  %v142_v57 = vsub.f32 0.0, %v30_v56  ;;  %v31_v58 = vld [vmem:[%s333_s3] sm:$0xff]  ;;  %s182_s3 = sshll.u32 %s247_s2, 4  ;;  %s183_s3 = int_to_ptr.vmem [resolvable:$true] %s182_s3 }
   0x8   :  { %v41_v32 = vsel %vm40_vm4, %v297_v3, 0.0  ;;  %vm118_vm8 = vcmp.ge.s32.totalorder %v300_v8, 64  ;;  %vm135_vm9 = vcmp.eq.s32.totalorder %v300_v8, 127 }
   0xc   :  { %49 = vperm.xlu0 %202, %v29_v2  }
  0x76   :  { %v55_v4 = vpop.permute.xlu0 %54 }
  0x77   :  { %v57_v5 = vmul.f32 %v55_v4, %v297_v3 }
  0x79   :  { %62 = vrot.lane.b32.xlu1 %v57_v5, %s240_s0 }
  0x7e   :  { %v50_v6 = vpop.permute.xlu0 %49 }
  0x81   :  { %59 = vrot.lane.b32.xlu1 %v50_v6, %s240_s0 }
  0xeb   :  { %v63_v9 = vpop.permute.xlu1 %62 }
  0xec   :  { %v64_v10 = vsel %vm58_vm0, %v63_v9, 0.0 }
  0xed   :  { %v65_v11 = vmul.f32 %v64_v10, %v50_v6 }
  0xef   :  { %v66_v12 = vadd.f32 %v65_v11, %v57_v5 }
  0xf1   :  { %72 = vrot.lane.b32.xlu2 %v66_v12, %s241_s1 }
  0xf3   :  { %v60_v13 = vpop.permute.xlu1 %59 }
  0xf4   :  { %v61_v14 = vsel %vm58_vm0, %v60_v13, 1.0 }
  0xf5   :  { %v67_v15 = vmul.f32 %v61_v14, %v50_v6 }
  0xf9   :  { %69 = vrot.lane.b32.xlu2 %v67_v15, %s241_s1 }
 0x14b   :  { %v73_v16 = vpop.permute.xlu2 %72 }
 0x14c   :  { %v74_v17 = vsel %vm68_vm1, %v73_v16, 0.0 }
 0x14d   :  { %v75_v18 = vmul.f32 %v74_v17, %v67_v15 }
 0x14f   :  { %v76_v19 = vadd.f32 %v75_v18, %v66_v12 }
 0x151   :  { %82 = vrot.lane.b32.xlu0 %v76_v19, %s242_s6 }
 0x153   :  { %v70_v20 = vpop.permute.xlu2 %69 }
 0x154   :  { %v71_v21 = vsel %vm68_vm1, %v70_v20, 1.0 }
 0x155   :  { %v77_v22 = vmul.f32 %v71_v21, %v67_v15 }
 0x157   :  { %79 = vrot.lane.b32.xlu1 %v77_v22, %s242_s6 }
 0x1c3   :  { %v83_v23 = vpop.permute.xlu0 %82 }
 0x1c4   :  { %v84_v24 = vsel %vm78_vm2, %v83_v23, 0.0 }
 0x1c5   :  { %v85_v25 = vmul.f32 %v84_v24, %v77_v22 }
 0x1c7   :  { %v86_v26 = vadd.f32 %v85_v25, %v76_v19 }
 0x1c9   :  { %v80_v27 = vpop.permute.xlu1 %79  ;;  %92 = vrot.lane.b32.xlu2 %v86_v26, %s243_s30 }
 0x1ca   :  { %v81_v28 = vsel %vm78_vm2, %v80_v27, 1.0 }
 0x1cb   :  { %v87_v29 = vmul.f32 %v81_v28, %v77_v22 }
 0x1cd   :  { %89 = vrot.lane.b32.xlu0 %v87_v29, %s243_s30 }
 0x1f7   :  { %42 = vadd.xlane.f32.xlu0 %v41_v32 }
 0x223   :  { %v93_v30 = vpop.permute.xlu2 %92 }
 0x224   :  { %v94_v31 = vsel %vm88_vm3, %v93_v30, 0.0 }
 0x225   :  { %v95_v33 = vmul.f32 %v94_v31, %v87_v29 }
 0x227   :  { %v96_v34 = vadd.f32 %v95_v33, %v86_v26 }
 0x229   :  { %102 = vrot.lane.b32.xlu1 %v96_v34, %s244_s8 }
 0x23f   :  { %v90_v35 = vpop.permute.xlu0 %89 }
 0x240   :  { %v91_v36 = vsel %vm88_vm3, %v90_v35, 1.0 }
 0x241   :  { %v97_v37 = vmul.f32 %v91_v36, %v87_v29 }
 0x243   :  { %99 = vrot.lane.b32.xlu2 %v97_v37, %s244_s8 }
 0x26a   :  { %v43_v45 = vpop.xlane.xlu0 %42 }
 0x26b   :  { %45 = vst.msk [vmem:[#allocation2] sm:$0xff] %vm44_vm6, %v43_v45 }
 0x272   :  { %v46_v49 = vld [vmem:[#allocation2] sm:$0xff] }
 0x29b   :  { %v103_v38 = vpop.permute.xlu1 %102 }
 0x29c   :  { %v104_v39 = vsel %vm98_vm5, %v103_v38, 0.0 }
 0x29d   :  { %v105_v40 = vmul.f32 %v104_v39, %v97_v37  ;;  %v100_v41 = vpop.permute.xlu2 %99 }
 0x29e   :  { %v101_v42 = vsel %vm98_vm5, %v100_v41, 1.0 }
 0x29f   :  { %v106_v43 = vadd.f32 %v105_v40, %v96_v34  ;;  %v107_v44 = vmul.f32 %v101_v42, %v97_v37 }
 0x2a1   :  { %109 = vrot.lane.b32.xlu2 %v107_v44, %s245_s9  ;;  %112 = vrot.lane.b32.xlu1 %v106_v43, %s245_s9 }
 0x2fb   :  { %v110_v46 = vpop.permute.xlu2 %109 }
 0x2fc   :  { %v111_v47 = vsel %vm108_vm7, %v110_v46, 1.0 }
 0x2fd   :  { %v117_v48 = vmul.f32 %v111_v47, %v107_v44 }
 0x2ff   :  { %119 = vrot.lane.b32.xlu1 %v117_v48, %s246_s10 }
 0x307   :  { %130 = vperm.xlu1 %203, %v46_v49  }
 0x30f   :  { %156 = vperm.xlu1 %203, %v32_v50  }
 0x313   :  { %v113_v51 = vpop.permute.xlu1 %112 }
 0x314   :  { %v114_v52 = vsel %vm108_vm7, %v113_v51, 0.0 }
 0x315   :  { %v115_v54 = vmul.f32 %v114_v52, %v107_v44 }
 0x317   :  { %v116_v55 = vadd.f32 %v115_v54, %v106_v43  ;;  %172 = vperm.xlu1 %203, %v33_v53  }
 0x319   :  { %122 = vrot.lane.b32.xlu2 %v116_v55, %s246_s10 }
 0x321   :  { %147 = vperm.xlu2 %204, %v142_v57  }
 0x329   :  { %164 = vperm.xlu2 %204, %v31_v58  }
 0x371   :  { %v120_v59 = vpop.permute.xlu1 %119 }
 0x372   :  { %v121_v62 = vsel %vm118_vm8, %v120_v59, 1.0 }
 0x373   :  { %v123_v60 = vpop.permute.xlu2 %122  ;;  %v127_v0 = vmul.f32 %v121_v62, %v117_v48 }
 0x374   :  { %v124_v61 = vsel %vm118_vm8, %v123_v60, 0.0 }
 0x375   :  { %v125_v63 = vmul.f32 %v124_v61, %v117_v48 }
 0x377   :  { %v126_v2 = vadd.f32 %v125_v63, %v116_v55 }
 0x379   :  { %v131_v1 = vpop.permute.xlu1 %130 }
 0x37a   :  { %v133_v4 = vmul.f32 %v131_v1, %v127_v0 }
 0x37b   :  { %v148_v10 = vpop.permute.xlu2 %147 }
 0x37c   :  { %v134_v5 = vadd.f32 %v133_v4, %v126_v2 }
 0x37e   :  { %v136_v6 = vsel %vm135_vm9, %v134_v5, 0.0  ;;  %v141_v7 = vadd.f32 1e-06, %v134_v5 }
 0x37f   :  { %137 = vadd.xlane.f32.xlu2 %v136_v6 }
 0x380   :  { %205 = vlog2.f32 %v141_v7 }
 0x381   :  { %v157_v16 = vpop.permute.xlu1 %156 }
 0x383   :  { %v165_v19 = vpop.permute.xlu2 %164 }
 0x386   :  { %v206_v9 = vpop.eup %205 }
 0x387   :  { %v144_v11 = vmul.f32 0.6931472, %v206_v9 }
 0x389   :  { %v150_v12 = vmul.f32 %v148_v10, %v144_v11  ;;  %v173_v23 = vpop.permute.xlu1 %172 }
 0x38b   :  { %v151_v13 = vmul.f32 1.442695, %v150_v12 }
 0x38d   :  { %207 = vpow2.f32 %v151_v13 }
 0x393   :  { %v208_v14 = vpop.eup %207 }
 0x394   :  { %v153_v15 = vmul.f32 %v208_v14, %v297_v3 }
 0x396   :  { %v159_v17 = vadd.f32 %v157_v16, %v153_v15 }
 0x398   :  { %209 = vlog2.f32 %v159_v17 }
 0x39e   :  { %v210_v18 = vpop.eup %209 }
 0x39f   :  { %v161_v8 = vmul.f32 0.6931472, %v210_v18 }
 0x3a1   :  { %v167_v20 = vmul.f32 %v165_v19, %v161_v8 }
 0x3a3   :  { %v168_v21 = vmul.f32 1.442695, %v167_v20 }
 0x3a5   :  { %211 = vpow2.f32 %v168_v21 }
 0x3ab   :  { %v212_v22 = vpop.eup %211 }
 0x3ac   :  { %v175_v24 = vsub.f32 %v212_v22, %v173_v23 }
 0x3ae   :  { %176 = vst [vmem:[#allocation3] sm:$0xff] %v175_v24 }
 0x3af   :  { %187 = dma.vmem_to_hbm [thread:$0]  %s183_s3, 128, %s185_s19, [#allocation4]  }
 0x3f2   :  { %v138_v3 = vpop.xlane.xlu2 %137 }
 0x3f3   :  { %140 = vst.msk [vmem:[#allocation2] sm:$0xff] %vm44_vm6, %v138_v3 }
 0x3f4   :  { %237 = dma.done.wait [#allocation4], 128  }
 0x3f5   :  { %238 = vsyncadd [#allocation4], 4294967168 }
 0x3f6   :  { %192 = vsyncpa [#allocation4], 1 }

</bundles_post_ra>
